<compile_context>
chip_gen: v7x
topology: tpu7x:2x2x1
jax: 0.10.0
libtpu: 0.0.40
codegen_flags: <defaults>
</compile_context>

<pallas_src>
import jax
import jax.numpy as jnp
import numpy as np
from jax.experimental import pallas as pl
from jax.experimental.pallas import tpu as pltpu


def seq_model_padded_kernel(x_ref, lens_ref, wblk_ref, bhh_ref, whh_ref,
                            wout_ref, bout_ref, out_ref):
    T, H, _ = whh_ref.shape          # (T, H, H)
    B = x_ref.shape[0]               # (B, T*I)

    # Hoisted input projection for ALL timesteps: one (B,T*I)@(T*I,T*H)
    # block-diagonal MXU matmul + bias row.  Column block t*H:(t+1)*H equals
    # x[:, t, :] @ W_xh[t] + b_hh[t]; it does not depend on the hidden state,
    # so it is off the serial critical path.
    xh = (jnp.dot(x_ref[...], wblk_ref[...],
                  preferred_element_type=jnp.float32)
          + bhh_ref[...])                                   # (B, T*H) f32

    # Hoisted padding masks (lane-dense): one lane broadcast of the lengths and
    # T scalar compares, all before the recurrence.
    lens_bh = jnp.broadcast_to(lens_ref[...], (B, H))       # (B, H) int32
    masks = [lens_bh > t for t in range(T)]                 # T x (B, H) bool

    # Serial recurrence (T small & static -> full unroll).  Per-step body is
    # only: matmul -> add -> tanh -> vselect.
    h = jnp.zeros((B, H), dtype=jnp.float32)
    for t in range(T):
        pre = xh[:, t * H:(t + 1) * H]
        if t > 0:   # h == 0 at t == 0, so dot(h, W_hh[0]) contributes nothing
            pre = jnp.dot(h, whh_ref[t],
                          preferred_element_type=jnp.float32) + pre
        new_h = jnp.tanh(pre)
        h = jnp.where(masks[t], new_h, h)                   # single vselect

    # Output head (output_size == 1): VPU multiply + lane reduction instead of
    # a 1-column MXU matmul.
    out_ref[...] = (jnp.sum(h * wout_ref[...], axis=-1, keepdims=True)
                    + bout_ref[...]).astype(out_ref.dtype)


def pack_params(params):
    """One-time packing of the natural per-step parameters into kernel operands."""
    wxh, whh, bhh, wout, bout = params   # (T,I,H), (T,H,H), (T,1,H), (H,O), (1,O)
    T, I, H = wxh.shape
    # Block-diagonal projection weight: (T*I, T*H).
    w_blk = jnp.zeros((T * I, T * H), jnp.float32)
    for t in range(T):
        w_blk = w_blk.at[t * I:(t + 1) * I, t * H:(t + 1) * H].set(wxh[t])
    bhh_flat = bhh.reshape(1, T * H)     # row-major: block t*H:(t+1)*H == bhh[t]
    wout_row = wout.T                    # (O, H); head implemented for O == 1
    return w_blk, bhh_flat, whh, wout_row, bout


def seq_model_padded(input_seq, seq_lengths, packed_params):
    """input_seq: (B, T, I) f32 batch-first; seq_lengths: (B,) int.
       Returns (B, 1) f32 matching SequenceModelPadded.forward."""
    w_blk, bhh_flat, whh, wout_row, bout = packed_params
    B, T, I = input_seq.shape
    O = bout.shape[-1]
    assert O == 1 and wout_row.shape[0] == 1   # module spec: output_size == 1

    x_flat = input_seq.reshape(B, T * I)                 # free contiguous reshape
    lens = seq_lengths.astype(jnp.int32).reshape(B, 1)   # (B, 1)

    vmem = lambda: pl.BlockSpec(memory_space=pltpu.MemorySpace.VMEM)
    return pl.pallas_call(
        seq_model_padded_kernel,
        out_shape=jax.ShapeDtypeStruct((B, O), jnp.float32),
        in_specs=[vmem() for _ in range(7)],
        out_specs=vmem(),
    )(x_flat, lens, w_blk, bhh_flat, whh, wout_row, bout)


def seq_model_padded_ref(input_seq, seq_lengths, params):
    """Pure-JAX reference mirroring the PyTorch forward loop (natural params)."""
    wxh, whh, bhh, wout, bout = params
    B, T, _ = input_seq.shape
    H = wxh.shape[-1]
    hidden = jnp.zeros((B, H), dtype=jnp.float32)
    for t in range(T):
        mask = (t < seq_lengths).astype(jnp.float32)[:, None]
        x_t = input_seq[:, t, :]
        new_h = jnp.tanh(x_t @ wxh[t] + hidden @ whh[t] + bhh[t])
        hidden = mask * new_h + (1.0 - mask) * hidden
    return hidden @ wout + bout


def init_params(key, seq_len, input_size, hidden_size, output_size):
    """Deterministic, PyTorch-Linear-style uniform init (synthetic weights).
       Stored already transposed so math is x @ W (== x @ W_torch^T)."""
    ks = jax.random.split(key, 5)
    bx = 1.0 / np.sqrt(input_size)
    bh = 1.0 / np.sqrt(hidden_size)
    wxh = jax.random.uniform(ks[0], (seq_len, input_size, hidden_size),
                             jnp.float32, -bx, bx)
    whh = jax.random.uniform(ks[1], (seq_len, hidden_size, hidden_size),
                             jnp.float32, -bh, bh)
    bhh = jax.random.uniform(ks[2], (seq_len, 1, hidden_size),
                             jnp.float32, -bh, bh)
    wout = jax.random.uniform(ks[3], (hidden_size, output_size),
                              jnp.float32, -bh, bh)
    bout = jax.random.uniform(ks[4], (1, output_size),
                              jnp.float32, -bh, bh)
    return wxh, whh, bhh, wout, bout


if __name__ == "__main__":
    # shapes matching the module's constants (all small)
    batch_size = 32
    seq_len = 8
    input_size = 10
    hidden_size = 64
    output_size = 1

    key = jax.random.PRNGKey(0)
    k_x, k_l, k_p = jax.random.split(key, 3)

    input_seq = jax.random.normal(
        k_x, (batch_size, seq_len, input_size), dtype=jnp.float32)
    seq_lengths = jax.random.randint(
        k_l, (batch_size,), 1, seq_len + 1, dtype=jnp.int32)

    params = init_params(k_p, seq_len, input_size, hidden_size, output_size)
    packed = pack_params(params)     # one-time weight packing (not per-forward)

    out = seq_model_padded(input_seq, seq_lengths, packed)
    out = jax.block_until_ready(out)

    ref = seq_model_padded_ref(input_seq, seq_lengths, params)
    np.testing.assert_allclose(np.asarray(out), np.asarray(ref),
                               rtol=2e-5, atol=2e-5)

    print("KERNEL_OK")
</pallas_src>

<mosaic_0001>
module attributes {stable_mosaic.version = 11 : i64} {
  func.func @seq_model_padded_kernel(%arg0: memref<32x80xf32, #tpu.memory_space<vmem>>, %arg1: memref<32x1xi32, #tpu.memory_space<vmem>>, %arg2: memref<80x512xf32, #tpu.memory_space<vmem>>, %arg3: memref<1x512xf32, #tpu.memory_space<vmem>>, %arg4: memref<8x64x64xf32, #tpu.memory_space<vmem>>, %arg5: memref<1x64xf32, #tpu.memory_space<vmem>>, %arg6: memref<1x1xf32, #tpu.memory_space<vmem>>, %arg7: memref<32x1xf32, #tpu.memory_space<vmem>>) attributes {dimension_semantics = [], scalar_prefetch = 0 : i64, scratch_operands = 0 : i64, tpu.core_type = #tpu.core_type<tc>} {
    %c0 = arith.constant 0 : index
    %c0_0 = arith.constant 0 : index
    %0 = vector.load %arg0[%c0, %c0_0] : memref<32x80xf32, #tpu.memory_space<vmem>>, vector<32x80xf32>
    %c0_1 = arith.constant 0 : index
    %c0_2 = arith.constant 0 : index
    %1 = vector.load %arg2[%c0_1, %c0_2] : memref<80x512xf32, #tpu.memory_space<vmem>>, vector<80x512xf32>
    %cst = arith.constant dense<0.000000e+00> : vector<32x512xf32>
    %2 = tpu.matmul %0, %1, %cst {dimension_numbers = #tpu.dot_dimension_numbers<[1], [0], [0], [1], [0, 0, 1, 1], [], []>} : vector<32x80xf32>, vector<80x512xf32>, vector<32x512xf32> -> vector<32x512xf32>
    %c0_3 = arith.constant 0 : index
    %c0_4 = arith.constant 0 : index
    %3 = vector.load %arg3[%c0_3, %c0_4] : memref<1x512xf32, #tpu.memory_space<vmem>>, vector<1x512xf32>
    %4 = vector.broadcast %3 : vector<1x512xf32> to vector<32x512xf32>
    %5 = arith.addf %2, %4 : vector<32x512xf32>
    %c0_5 = arith.constant 0 : index
    %c0_6 = arith.constant 0 : index
    %6 = vector.load %arg1[%c0_5, %c0_6] : memref<32x1xi32, #tpu.memory_space<vmem>>, vector<32x1xi32>
    %7 = vector.shape_cast %6 : vector<32x1xi32> to vector<32x1xi32>
    %8 = vector.broadcast %7 : vector<32x1xi32> to vector<32x64xi32>
    %c0_i32 = arith.constant 0 : i32
    %9 = vector.broadcast %c0_i32 : i32 to vector<32x64xi32>
    %10 = arith.cmpi sgt, %8, %9 : vector<32x64xi32>
    %c1_i32 = arith.constant 1 : i32
    %11 = vector.broadcast %c1_i32 : i32 to vector<32x64xi32>
    %12 = arith.cmpi sgt, %8, %11 : vector<32x64xi32>
    %c2_i32 = arith.constant 2 : i32
    %13 = vector.broadcast %c2_i32 : i32 to vector<32x64xi32>
    %14 = arith.cmpi sgt, %8, %13 : vector<32x64xi32>
    %c3_i32 = arith.constant 3 : i32
    %15 = vector.broadcast %c3_i32 : i32 to vector<32x64xi32>
    %16 = arith.cmpi sgt, %8, %15 : vector<32x64xi32>
    %c4_i32 = arith.constant 4 : i32
    %17 = vector.broadcast %c4_i32 : i32 to vector<32x64xi32>
    %18 = arith.cmpi sgt, %8, %17 : vector<32x64xi32>
    %c5_i32 = arith.constant 5 : i32
    %19 = vector.broadcast %c5_i32 : i32 to vector<32x64xi32>
    %20 = arith.cmpi sgt, %8, %19 : vector<32x64xi32>
    %c6_i32 = arith.constant 6 : i32
    %21 = vector.broadcast %c6_i32 : i32 to vector<32x64xi32>
    %22 = arith.cmpi sgt, %8, %21 : vector<32x64xi32>
    %c7_i32 = arith.constant 7 : i32
    %23 = vector.broadcast %c7_i32 : i32 to vector<32x64xi32>
    %24 = arith.cmpi sgt, %8, %23 : vector<32x64xi32>
    %cst_7 = arith.constant 0.000000e+00 : f32
    %25 = vector.broadcast %cst_7 : f32 to vector<32x64xf32>
    %26 = vector.extract_strided_slice %5 {offsets = [0, 0], sizes = [32, 64], strides = [1, 1]} : vector<32x512xf32> to vector<32x64xf32>
    %27 = math.tanh %26 : vector<32x64xf32>
    %28 = arith.select %10, %27, %25 : vector<32x64xi1>, vector<32x64xf32>
    %29 = vector.extract_strided_slice %5 {offsets = [0, 64], sizes = [32, 64], strides = [1, 1]} : vector<32x512xf32> to vector<32x64xf32>
    %c1 = arith.constant 1 : index
    %c0_8 = arith.constant 0 : index
    %c0_9 = arith.constant 0 : index
    %30 = vector.load %arg4[%c1, %c0_8, %c0_9] : memref<8x64x64xf32, #tpu.memory_space<vmem>>, vector<1x64x64xf32>
    %31 = vector.shape_cast %30 : vector<1x64x64xf32> to vector<64x64xf32>
    %cst_10 = arith.constant dense<0.000000e+00> : vector<32x64xf32>
    %32 = tpu.matmul %28, %31, %cst_10 {dimension_numbers = #tpu.dot_dimension_numbers<[1], [0], [0], [1], [0, 0, 1, 1], [], []>} : vector<32x64xf32>, vector<64x64xf32>, vector<32x64xf32> -> vector<32x64xf32>
    %33 = arith.addf %32, %29 : vector<32x64xf32>
    %34 = math.tanh %33 : vector<32x64xf32>
    %35 = arith.select %12, %34, %28 : vector<32x64xi1>, vector<32x64xf32>
    %36 = vector.extract_strided_slice %5 {offsets = [0, 128], sizes = [32, 64], strides = [1, 1]} : vector<32x512xf32> to vector<32x64xf32>
    %c2 = arith.constant 2 : index
    %c0_11 = arith.constant 0 : index
    %c0_12 = arith.constant 0 : index
    %37 = vector.load %arg4[%c2, %c0_11, %c0_12] : memref<8x64x64xf32, #tpu.memory_space<vmem>>, vector<1x64x64xf32>
    %38 = vector.shape_cast %37 : vector<1x64x64xf32> to vector<64x64xf32>
    %cst_13 = arith.constant dense<0.000000e+00> : vector<32x64xf32>
    %39 = tpu.matmul %35, %38, %cst_13 {dimension_numbers = #tpu.dot_dimension_numbers<[1], [0], [0], [1], [0, 0, 1, 1], [], []>} : vector<32x64xf32>, vector<64x64xf32>, vector<32x64xf32> -> vector<32x64xf32>
    %40 = arith.addf %39, %36 : vector<32x64xf32>
    %41 = math.tanh %40 : vector<32x64xf32>
    %42 = arith.select %14, %41, %35 : vector<32x64xi1>, vector<32x64xf32>
    %43 = vector.extract_strided_slice %5 {offsets = [0, 192], sizes = [32, 64], strides = [1, 1]} : vector<32x512xf32> to vector<32x64xf32>
    %c3 = arith.constant 3 : index
    %c0_14 = arith.constant 0 : index
    %c0_15 = arith.constant 0 : index
    %44 = vector.load %arg4[%c3, %c0_14, %c0_15] : memref<8x64x64xf32, #tpu.memory_space<vmem>>, vector<1x64x64xf32>
    %45 = vector.shape_cast %44 : vector<1x64x64xf32> to vector<64x64xf32>
    %cst_16 = arith.constant dense<0.000000e+00> : vector<32x64xf32>
    %46 = tpu.matmul %42, %45, %cst_16 {dimension_numbers = #tpu.dot_dimension_numbers<[1], [0], [0], [1], [0, 0, 1, 1], [], []>} : vector<32x64xf32>, vector<64x64xf32>, vector<32x64xf32> -> vector<32x64xf32>
    %47 = arith.addf %46, %43 : vector<32x64xf32>
    %48 = math.tanh %47 : vector<32x64xf32>
    %49 = arith.select %16, %48, %42 : vector<32x64xi1>, vector<32x64xf32>
    %50 = vector.extract_strided_slice %5 {offsets = [0, 256], sizes = [32, 64], strides = [1, 1]} : vector<32x512xf32> to vector<32x64xf32>
    %c4 = arith.constant 4 : index
    %c0_17 = arith.constant 0 : index
    %c0_18 = arith.constant 0 : index
    %51 = vector.load %arg4[%c4, %c0_17, %c0_18] : memref<8x64x64xf32, #tpu.memory_space<vmem>>, vector<1x64x64xf32>
    %52 = vector.shape_cast %51 : vector<1x64x64xf32> to vector<64x64xf32>
    %cst_19 = arith.constant dense<0.000000e+00> : vector<32x64xf32>
    %53 = tpu.matmul %49, %52, %cst_19 {dimension_numbers = #tpu.dot_dimension_numbers<[1], [0], [0], [1], [0, 0, 1, 1], [], []>} : vector<32x64xf32>, vector<64x64xf32>, vector<32x64xf32> -> vector<32x64xf32>
    %54 = arith.addf %53, %50 : vector<32x64xf32>
    %55 = math.tanh %54 : vector<32x64xf32>
    %56 = arith.select %18, %55, %49 : vector<32x64xi1>, vector<32x64xf32>
    %57 = vector.extract_strided_slice %5 {offsets = [0, 320], sizes = [32, 64], strides = [1, 1]} : vector<32x512xf32> to vector<32x64xf32>
    %c5 = arith.constant 5 : index
    %c0_20 = arith.constant 0 : index
    %c0_21 = arith.constant 0 : index
    %58 = vector.load %arg4[%c5, %c0_20, %c0_21] : memref<8x64x64xf32, #tpu.memory_space<vmem>>, vector<1x64x64xf32>
    %59 = vector.shape_cast %58 : vector<1x64x64xf32> to vector<64x64xf32>
    %cst_22 = arith.constant dense<0.000000e+00> : vector<32x64xf32>
    %60 = tpu.matmul %56, %59, %cst_22 {dimension_numbers = #tpu.dot_dimension_numbers<[1], [0], [0], [1], [0, 0, 1, 1], [], []>} : vector<32x64xf32>, vector<64x64xf32>, vector<32x64xf32> -> vector<32x64xf32>
    %61 = arith.addf %60, %57 : vector<32x64xf32>
    %62 = math.tanh %61 : vector<32x64xf32>
    %63 = arith.select %20, %62, %56 : vector<32x64xi1>, vector<32x64xf32>
    %64 = vector.extract_strided_slice %5 {offsets = [0, 384], sizes = [32, 64], strides = [1, 1]} : vector<32x512xf32> to vector<32x64xf32>
    %c6 = arith.constant 6 : index
    %c0_23 = arith.constant 0 : index
    %c0_24 = arith.constant 0 : index
    %65 = vector.load %arg4[%c6, %c0_23, %c0_24] : memref<8x64x64xf32, #tpu.memory_space<vmem>>, vector<1x64x64xf32>
    %66 = vector.shape_cast %65 : vector<1x64x64xf32> to vector<64x64xf32>
    %cst_25 = arith.constant dense<0.000000e+00> : vector<32x64xf32>
    %67 = tpu.matmul %63, %66, %cst_25 {dimension_numbers = #tpu.dot_dimension_numbers<[1], [0], [0], [1], [0, 0, 1, 1], [], []>} : vector<32x64xf32>, vector<64x64xf32>, vector<32x64xf32> -> vector<32x64xf32>
    %68 = arith.addf %67, %64 : vector<32x64xf32>
    %69 = math.tanh %68 : vector<32x64xf32>
    %70 = arith.select %22, %69, %63 : vector<32x64xi1>, vector<32x64xf32>
    %71 = vector.extract_strided_slice %5 {offsets = [0, 448], sizes = [32, 64], strides = [1, 1]} : vector<32x512xf32> to vector<32x64xf32>
    %c7 = arith.constant 7 : index
    %c0_26 = arith.constant 0 : index
    %c0_27 = arith.constant 0 : index
    %72 = vector.load %arg4[%c7, %c0_26, %c0_27] : memref<8x64x64xf32, #tpu.memory_space<vmem>>, vector<1x64x64xf32>
    %73 = vector.shape_cast %72 : vector<1x64x64xf32> to vector<64x64xf32>
    %cst_28 = arith.constant dense<0.000000e+00> : vector<32x64xf32>
    %74 = tpu.matmul %70, %73, %cst_28 {dimension_numbers = #tpu.dot_dimension_numbers<[1], [0], [0], [1], [0, 0, 1, 1], [], []>} : vector<32x64xf32>, vector<64x64xf32>, vector<32x64xf32> -> vector<32x64xf32>
    %75 = arith.addf %74, %71 : vector<32x64xf32>
    %76 = math.tanh %75 : vector<32x64xf32>
    %77 = arith.select %24, %76, %70 : vector<32x64xi1>, vector<32x64xf32>
    %c0_29 = arith.constant 0 : index
    %c0_30 = arith.constant 0 : index
    %78 = vector.load %arg5[%c0_29, %c0_30] : memref<1x64xf32, #tpu.memory_space<vmem>>, vector<1x64xf32>
    %79 = vector.broadcast %78 : vector<1x64xf32> to vector<32x64xf32>
    %80 = arith.mulf %77, %79 : vector<32x64xf32>
    %cst_31 = arith.constant dense<0.000000e+00> : vector<32xf32>
    %81 = vector.multi_reduction <add>, %80, %cst_31 [1] : vector<32x64xf32> to vector<32xf32>
    %82 = vector.shape_cast %81 : vector<32xf32> to vector<32x1xf32>
    %c0_32 = arith.constant 0 : index
    %c0_33 = arith.constant 0 : index
    %83 = vector.load %arg6[%c0_32, %c0_33] : memref<1x1xf32, #tpu.memory_space<vmem>>, vector<1x1xf32>
    %84 = vector.broadcast %83 : vector<1x1xf32> to vector<32x1xf32>
    %85 = arith.addf %82, %84 : vector<32x1xf32>
    %c0_34 = arith.constant 0 : index
    %c0_35 = arith.constant 0 : index
    %86 = vector.load %arg7[%c0_34, %c0_35] : memref<32x1xf32, #tpu.memory_space<vmem>>, vector<32x1xf32>
    tpu.vector_store %arg7[%c0_34, %c0_35], %85 {strides = array<i32>} : memref<32x1xf32, #tpu.memory_space<vmem>>, vector<32x1xf32>,
    return
  }
}

</mosaic_0001>

<bundles_post_ra>
// kernel: tpu_custom_call.1
= control target key start
LH: loop header
LB: loop body
LE: loop exit
PB: predicated region body
PF: predicated region fallthrough
CT: control target
= control target key end

     0   :  { %s2160_s0 = inlined_call_operand.vmem [shape: f32[32,80], index: 0, kind: input, shape index: {}]   ;;  %s2161_s1 = inlined_call_operand.vmem [shape: s32[32,1], index: 1, kind: input, shape index: {}]   ;;  %s2162_s2 = inlined_call_operand.hbm [shape: f32[80,512], index: 2, kind: input, shape index: {}]   ;;  %s2163_s3 = inlined_call_operand.vmem [shape: f32[1,512], index: 3, kind: input, shape index: {}]   ;;  %s2164_s4 = inlined_call_operand.hbm [shape: f32[8,64,64], index: 4, kind: input, shape index: {}]   ;;  %s2165_s5 = inlined_call_operand.vmem [shape: f32[1,64], index: 5, kind: input, shape index: {}]   ;;  %s2166_s6 = inlined_call_operand.<no memory space> [shape: f32[1,1], index: 6, kind: input, shape index: {}]   ;;  %s2167_s7 = inlined_call_operand.vmem [shape: f32[32,1], index: 7, kind: output, shape index: {}]  }
   0x1   :  { %v12_v0 = vstv %s2166_s6 }
   0x2   :  { %13 = vst [vmem:[#allocation2] sm:$0x1] %v12_v0 }
   0x3   :  { %14 = vsyncpa [#allocation4], 0 }
   0x4   :  { %15 = vsyncpa [#allocation6], 0  ;;  %s1836_s26 = smov [#allocation3]   ;;  %s1788_s30 = scalar_lea.hbm %s2162_s2, 5120 }
   0x5   :  { %s25_s27 = sshll.u32 %s1836_s26, 4  ;;  %p1789_p0 = scmp.ne.s32.totalorder %s2162_s2, %s1788_s30  ;;  %s26_s27 = int_to_ptr.vmem [resolvable:$true] %s25_s27 }
   0x6   :  { %p1792_p1 = scmp.lt.u32.totalorder %s1788_s30, %s2162_s2 }
   0x8   :  { %p1794_p2 = pnand %p1792_p1, %p1789_p0 }
   0xa   :  { %1797 = shalt.err (!%p1794_p2)
}
   0xb   :  { %s1798_s6 = scalar_lea.vmem %s26_s27, 5120  ;;  %p1803_p4 = scmp.lt.s32.totalorder %s26_s27, %s26_s27 }
   0xc   :  { %p1799_p3 = scmp.ne.s32.totalorder %s26_s27, %s1798_s6  ;;  %p1804_p5 = scmp.lt.s32.totalorder %s1798_s6, %s1798_s6 }
   0xe   :  { %p1805_p6 = por %p1804_p5, %p1803_p4 }
  0x10   :  { %p1806_p7 = pnand %p1805_p6, %p1799_p3 }
  0x12   :  { %1809 = shalt.err (!%p1806_p7)
}
  0x13   :  { %s1837_s12 = smov 512   ;;  %s1838_s13 = smov 32  }
  0x14   :  { %31 = dma.hbm_to_vmem [thread:$0]  %s2162_s2, 5120, %s26_s27, [#allocation4], %s1837_s12, %s1837_s12, %s1838_s13  }
  0x15   :  { %s1839_s16 = smov [#allocation5]   ;;  %s1810_s20 = scalar_lea.hbm %s2164_s4, 8192 }
  0x16   :  { %s39_s17 = sshll.u32 %s1839_s16, 4  ;;  %p1811_p8 = scmp.ne.s32.totalorder %s2164_s4, %s1810_s20  ;;  %s40_s17 = int_to_ptr.vmem [resolvable:$true] %s39_s17 }
  0x17   :  { %p1814_p9 = scmp.lt.u32.totalorder %s1810_s20, %s2164_s4 }
  0x19   :  { %p1816_p10 = pnand %p1814_p9, %p1811_p8 }
  0x1b   :  { %1819 = shalt.err (!%p1816_p10)
}
  0x1c   :  { %s1820_s25 = scalar_lea.vmem %s40_s17, 8192  ;;  %p1825_p12 = scmp.lt.s32.totalorder %s40_s17, %s40_s17 }
  0x1d   :  { %p1821_p11 = scmp.ne.s32.totalorder %s40_s17, %s1820_s25  ;;  %p1826_p13 = scmp.lt.s32.totalorder %s1820_s25, %s1820_s25 }
  0x1f   :  { %p1827_p0 = por %p1826_p13, %p1825_p12 }
  0x21   :  { %p1828_p1 = pnand %p1827_p0, %p1821_p11 }
  0x23   :  { %1831 = shalt.err (!%p1828_p1)
}
  0x24   :  { %s1840_s2 = smov 128   ;;  %s1841_s26 = smov 8  }
  0x25   :  { %45 = dma.hbm_to_vmem [thread:$0]  %s2164_s4, 8192, %s40_s17, [#allocation6], %s1840_s2, %s1840_s2, %s1841_s26  }
  0x26   :  { %1832 = dma.done.wait [#allocation4], 5120  }
  0x27   :  { %1833 = vsyncadd [#allocation4], 4294962176 }
  0x28   :  { %1834 = dma.done.wait [#allocation6], 8192  }
  0x29   :  { %1835 = vsyncadd [#allocation6], 4294959104  ;;  %v1842_v1 = vmov 0.0   ;;  %v1843_v2 = vmov 0   ;;  %v61_v3 = vld [vmem:[#allocation3 + $0x8] sm:$0xff]  ;;  %v60_v5 = vld [vmem:[#allocation3] sm:$0xff]  ;;  %v102_v53 = vlaneseq }
  0x2a   :  { %199 = vmatprep.mubr.f32.mxu0 %v1842_v1  ;;  %1722 = vset.pattern.permute.xlu0 %v1843_v2  ;;  %v65_v4 = vld [vmem:[#allocation3 + $0x28] sm:$0xff]  ;;  %v64_v7 = vld [vmem:[#allocation3 + $0x20] sm:$0xff]  ;;  %v316_v31 = vld [vmem:[%s2161_s1 + $0x18] sm:$0xff]  ;;  %vm122_vm0 = vcmask 654336   ;;  %s1844_s20 = smov 64   ;;  %vm394_vm2 = vcmask 523264  }
  0x2b   :  { %1723 = vset.pattern.permute.xlu1 %v1843_v2  ;;  %288 = vmatprep.mubr.f32.mxu1 %v1842_v1  ;;  %v1553_v6 = vpack.c.bf16 %v65_v4, %v61_v3  ;;  %v69_v8 = vld [vmem:[#allocation3 + $0x48] sm:$0xff]  ;;  %v1555_v10 = vpack.c.bf16 %v64_v7, %v60_v5  ;;  %v68_v12 = vld [vmem:[#allocation3 + $0x40] sm:$0xff]  ;;  %v1953_v40 = vld [vmem:[%s2160_s0 + $0x18] sm:$0xff]  ;;  %v1957_v54 = vshrl.u32 %v102_v53, 7 }
  0x2c   :  { %v73_v9 = vld [vmem:[#allocation3 + $0x68] sm:$0xff]  ;;  %v72_v13 = vld [vmem:[#allocation3 + $0x60] sm:$0xff]  ;;  %v372_v44 = vld [vmem:[#allocation5 + $0x50] sm:$0xff] }
  0x2d   :  { %v1557_v11 = vpack.c.bf16 %v73_v9, %v69_v8  ;;  %v77_v14 = vld [vmem:[#allocation3 + $0x88] sm:$0xff]  ;;  %1554 = vmatprep.subr.bf16.mxu0 %v1553_v6  ;;  %v1559_v16 = vpack.c.bf16 %v72_v13, %v68_v12  ;;  %v76_v18 = vld [vmem:[#allocation3 + $0x80] sm:$0xff]  ;;  %v373_v45 = vld [vmem:[#allocation5 + $0x58] sm:$0xff]  ;;  %v104_v55 = vsub.s32 0, %v1957_v54  ;;  %v108_v62 = vsub.s32 1, %v1957_v54 }
  0x2e   :  { %v81_v15 = vld [vmem:[#allocation3 + $0xa8] sm:$0xff]  ;;  %1556 = vmatpush1.bf16.msra.mxu0 %v1555_v10  ;;  %v80_v19 = vld [vmem:[#allocation3 + $0xa0] sm:$0xff]  ;;  %v1597_v46 = vpack.c.bf16 %v373_v45, %v372_v44  ;;  %v376_v50 = vld [vmem:[#allocation5 + $0x70] sm:$0xff] }
  0x2f   :  { %1558 = vmatprep.subr.bf16.mxu0 %v1557_v11  ;;  %v1561_v17 = vpack.c.bf16 %v81_v15, %v77_v14  ;;  %v85_v20 = vld [vmem:[#allocation3 + $0xc8] sm:$0xff]  ;;  %v1563_v22 = vpack.c.bf16 %v80_v19, %v76_v18  ;;  %v313_v23 = vld [vmem:[%s2161_s1] sm:$0xff]  ;;  %v62_v9 = vld [vmem:[#allocation3 + $0x10] sm:$0xff] }
  0x30   :  { %v89_v21 = vld [vmem:[#allocation3 + $0xe8] sm:$0xff]  ;;  %v84_v26 = vld [vmem:[#allocation3 + $0xc0] sm:$0xff]  ;;  %318 = vperm.xlu0 %1722, %v313_v23   ;;  %v377_v51 = vld [vmem:[#allocation5 + $0x78] sm:$0xff] }
  0x31   :  { %v315_v24 = vld [vmem:[%s2161_s1 + $0x10] sm:$0xff]  ;;  %v1565_v25 = vpack.c.bf16 %v89_v21, %v85_v20  ;;  %v88_v27 = vld [vmem:[#allocation3 + $0xe0] sm:$0xff]  ;;  %v1605_v52 = vpack.c.bf16 %v377_v51, %v376_v50  ;;  %v63_v7 = vld [vmem:[#allocation3 + $0x18] sm:$0xff] }
  0x32   :  { %1560 = vmatpush1.bf16.msra.mxu0 %v1559_v16  ;;  %v93_v28 = vld [vmem:[#allocation3 + $0x108] sm:$0xff]  ;;  %324 = vperm.xlu1 %1723, %v315_v24   ;;  %v1567_v32 = vpack.c.bf16 %v88_v27, %v84_v26  ;;  %v92_v34 = vld [vmem:[#allocation3 + $0x100] sm:$0xff]  ;;  %v67_v8 = vld [vmem:[#allocation3 + $0x38] sm:$0xff] }
  0x33   :  { %1562 = vmatprep.subr.bf16.mxu0 %v1561_v17  ;;  %v97_v29 = vld [vmem:[#allocation3 + $0x128] sm:$0xff]  ;;  %v96_v35 = vld [vmem:[#allocation3 + $0x120] sm:$0xff]  ;;  %v1573_v10 = vpack.c.bf16 %v67_v8, %v63_v7  ;;  %v66_v11 = vld [vmem:[#allocation3 + $0x30] sm:$0xff] }
  0x34   :  { %v314_v30 = vld [vmem:[%s2161_s1 + $0x8] sm:$0xff]  ;;  %v1569_v33 = vpack.c.bf16 %v97_v29, %v93_v28  ;;  %v1571_v36 = vpack.c.bf16 %v96_v35, %v92_v34  ;;  %v1929_v37 = vld [vmem:[%s2160_s0] sm:$0xff]  ;;  %v1945_v39 = vld [vmem:[%s2160_s0 + $0x10] sm:$0xff]  ;;  %v1575_v14 = vpack.c.bf16 %v66_v11, %v62_v9 }
  0x35   :  { %321 = vperm.xlu0 %1722, %v314_v30   ;;  %v1937_v38 = vld [vmem:[%s2160_s0 + $0x8] sm:$0xff]  ;;  %v1963_v56 = vld [vmem:[%s2163_s3] sm:$0xf]  ;;  %v70_v16 = vld [vmem:[#allocation3 + $0x50] sm:$0xff]  ;;  %1574 = vmatprep.subr.bf16.mxu1 %v1573_v10 }
  0x36   :  { %1564 = vmatpush1.bf16.msra.mxu0 %v1563_v22  ;;  %327 = vperm.xlu1 %1723, %v316_v31   ;;  %v370_v41 = vld [vmem:[#allocation5 + $0x40] sm:$0xff]  ;;  %v371_v42 = vld [vmem:[#allocation5 + $0x48] sm:$0xff]  ;;  %v105_v57 = vrot.slane %v1963_v56, %v104_v55  ;;  %v109_v4 = vrot.slane %v1963_v56, %v108_v62  ;;  %v71_v12 = vld [vmem:[#allocation3 + $0x58] sm:$0xff] }
  0x37   :  { %1566 = vmatprep.subr.bf16.mxu0 %v1565_v25  ;;  %v1593_v43 = vpack.c.bf16 %v371_v42, %v370_v41  ;;  %v374_v47 = vld [vmem:[#allocation5 + $0x60] sm:$0xff]  ;;  %v375_v48 = vld [vmem:[#allocation5 + $0x68] sm:$0xff]  ;;  %v75_v13 = vld [vmem:[#allocation3 + $0x78] sm:$0xff]  ;;  %1576 = vmatpush1.bf16.msra.mxu1 %v1575_v14 }
  0x38   :  { %v1601_v49 = vpack.c.bf16 %v375_v48, %v374_v47  ;;  %v1577_v15 = vpack.c.bf16 %v75_v13, %v71_v12  ;;  %v74_v17 = vld [vmem:[#allocation3 + $0x70] sm:$0xff]  ;;  %v79_v18 = vld [vmem:[#allocation3 + $0x98] sm:$0xff]  ;;  %v502_v62 = vld [vmem:[#allocation5 + $0x88] sm:$0xff]  ;;  %v112_v12 = vsub.s32 2, %v1957_v54 }
  0x39   :  { %v83_v21 = vld [vmem:[#allocation3 + $0xb8] sm:$0xff]  ;;  %v1579_v26 = vpack.c.bf16 %v74_v17, %v70_v16  ;;  %v78_v29 = vld [vmem:[#allocation3 + $0x90] sm:$0xff] }
  0x3a   :  { %1568 = vmatpush1.bf16.msra.mxu0 %v1567_v32  ;;  %1578 = vmatprep.subr.bf16.mxu1 %v1577_v15  ;;  %v1581_v28 = vpack.c.bf16 %v83_v21, %v79_v18  ;;  %v82_v30 = vld [vmem:[#allocation3 + $0xb0] sm:$0xff]  ;;  %v87_v31 = vld [vmem:[#allocation3 + $0xd8] sm:$0xff] }
  0x3b   :  { %1570 = vmatprep.subr.bf16.mxu0 %v1569_v33  ;;  %v91_v32 = vld [vmem:[#allocation3 + $0xf8] sm:$0xff]  ;;  %1580 = vmatpush1.bf16.msra.mxu1 %v1579_v26  ;;  %v1583_v41 = vpack.c.bf16 %v82_v30, %v78_v29  ;;  %v86_v44 = vld [vmem:[#allocation3 + $0xd0] sm:$0xff]  ;;  %v116_v29 = vsub.s32 3, %v1957_v54 }
  0x3c   :  { %1582 = vmatprep.subr.bf16.mxu1 %v1581_v28  ;;  %v90_v45 = vld [vmem:[#allocation3 + $0xf0] sm:$0xff]  ;;  %v99_v47 = vld [vmem:[#allocation3 + $0x138] sm:$0xff] }
  0x3d   :  { %v1587_v50 = vpack.c.bf16 %v90_v45, %v86_v44  ;;  %v94_v55 = vld [vmem:[#allocation3 + $0x110] sm:$0xff] }
  0x3e   :  { %1572 = vmatpush1.bf16.msra.mxu0 %v1571_v36 }
  0x3f   :  { %1594 = vmatprep.subr.bf16.mxu0 %v1593_v43  ;;  %1584 = vmatpush1.bf16.msra.mxu1 %v1583_v41 }
  0x41   :  { %1277 = vmatmul.mubr.msk.f32.vlgmr.msra.gmra.mrb[0].mxu0 %vm122_vm0, %v1929_v37 }
  0x42   :  { %205 = vmatprep.mubr.f32.mxu0 %v1842_v1  ;;  %1596 = vmatpush3.bf16.msra.mxu0 %v1593_v43  ;;  %v1585_v43 = vpack.c.bf16 %v91_v32, %v87_v31 }
  0x43   :  { %1598 = vmatprep.subr.bf16.mxu0 %v1597_v46 }
  0x44   :  { %1586 = vmatprep.subr.bf16.mxu1 %v1585_v43 }
  0x45   :  { %1278 = vmatmul.mubr.msk.f32.gmra.mrb[2].mxu0 %vm122_vm0, %v1937_v38  ;;  %1588 = vmatpush1.bf16.msra.mxu1 %v1587_v50 }
  0x46   :  { %211 = vmatprep.mubr.f32.mxu0 %v1842_v1  ;;  %1600 = vmatpush3.bf16.msra.mxu0 %v1597_v46  ;;  %v95_v46 = vld [vmem:[#allocation3 + $0x118] sm:$0xff] }
  0x47   :  { %1602 = vmatprep.subr.bf16.mxu0 %v1601_v49  ;;  %v1589_v53 = vpack.c.bf16 %v99_v47, %v95_v46 }
  0x49   :  { %1279 = vmatmul.mubr.msk.f32.gmra.mrb[4].mxu0 %vm122_vm0, %v1945_v39  ;;  %1590 = vmatprep.subr.bf16.mxu1 %v1589_v53 }
  0x4a   :  { %217 = vmatprep.mubr.f32.mxu0 %v1842_v1  ;;  %1604 = vmatpush3.bf16.msra.mxu0 %v1601_v49 }
  0x4b   :  { %1606 = vmatprep.subr.bf16.mxu0 %v1605_v52 }
  0x4d   :  { %1280 = vmatmul.mubr.msk.f32.gmra.mrb[6].mxu0 %vm122_vm0, %v1953_v40 }
  0x4e   :  { %1608 = vmatpush3.bf16.msra.mxu0 %v1605_v52 }
  0xaf   :  { %v1968_v2 = vpop.permute.xlu0 %318 }
  0xb0   :  { %vm329_vm1 = vcmp.gt.s32.totalorder %v1968_v2, 0  ;;  %vm333_vm6 = vcmp.gt.s32.totalorder %v1968_v2, 1  ;;  %vm337_vm10 = vcmp.gt.s32.totalorder %v1968_v2, 2  ;;  %vm341_vm14 = vcmp.gt.s32.totalorder %v1968_v2, 3 }
  0xb1   :  { %v1988_v33 = vpop.permute.xlu1 %324 }
  0xb2   :  { %vm331_vm4 = vcmp.gt.s32.totalorder %v1988_v33, 0  ;;  %vm335_vm8 = vcmp.gt.s32.totalorder %v1988_v33, 1  ;;  %vm339_vm12 = vcmp.gt.s32.totalorder %v1988_v33, 2 }
  0xb4   :  { %v1974_v20 = vpop.permute.xlu0 %321 }
  0xb5   :  { %vm330_vm3 = vcmp.gt.s32.totalorder %v1974_v20, 0  ;;  %v2005_v51 = vpop.permute.xlu1 %327  ;;  %vm334_vm7 = vcmp.gt.s32.totalorder %v1974_v20, 1  ;;  %vm338_vm11 = vcmp.gt.s32.totalorder %v1974_v20, 2  ;;  %vm342_vm15 = vcmp.gt.s32.totalorder %v1974_v20, 3 }
  0xb6   :  { %vm332_vm5 = vcmp.gt.s32.totalorder %v2005_v51, 0  ;;  %vm336_vm9 = vcmp.gt.s32.totalorder %v2005_v51, 1  ;;  %vm340_vm13 = vcmp.gt.s32.totalorder %v2005_v51, 2 }
 0x114   :  { %v201_v58 = vpop.f32.mrb[0].mxu0 }
 0x115   :  { %v202_v59 = vadd.f32 %v201_v58, %v105_v57  ;;  %v203_v60 = vpop.f32.mrb[1].mxu0 }
 0x116   :  { %v1976_v23 = vadd.f32 %v203_v60, %v109_v4 }
 0x117   :  { %1724 = vtanh.f32 %v202_v59  ;;  %382 = vrot.lane.b32.xlu0 %v202_v59, %s1844_s20 }
 0x118   :  { %v207_v61 = vpop.f32.mrb[2].mxu0 }
 0x119   :  { %v208_v63 = vadd.f32 %v207_v61, %v105_v57  ;;  %v209_v0 = vpop.f32.mrb[3].mxu0  ;;  %v501_v61 = vld [vmem:[#allocation5 + $0x80] sm:$0xff] }
 0x11a   :  { %v1990_v35 = vadd.f32 %v209_v0, %v109_v4  ;;  %v504_v0 = vld [vmem:[#allocation5 + $0x98] sm:$0xff] }
 0x11b   :  { %1726 = vtanh.f32 %v208_v63  ;;  %384 = vrot.lane.b32.xlu1 %v208_v63, %s1844_s20  ;;  %v1609_v63 = vpack.c.bf16 %v502_v62, %v501_v61  ;;  %v618_v61 = vld [vmem:[#allocation5 + $0xd8] sm:$0xff] }
 0x11c   :  { %v213_v3 = vpop.f32.mrb[4].mxu0 }
 0x11d   :  { %v214_v5 = vadd.f32 %v213_v3, %v105_v57  ;;  %v215_v6 = vpop.f32.mrb[5].mxu0 }
 0x11e   :  { %v1992_v36 = vadd.f32 %v215_v6, %v109_v4 }
 0x11f   :  { %1728 = vtanh.f32 %v214_v5  ;;  %386 = vrot.lane.b32.xlu0 %v214_v5, %s1844_s20 }
 0x120   :  { %v219_v19 = vpop.f32.mrb[6].mxu0 }
 0x121   :  { %v1725_v22 = vpop.eup %1724  ;;  %v220_v24 = vadd.f32 %v219_v19, %v105_v57  ;;  %v221_v25 = vpop.f32.mrb[7].mxu0  ;;  %v98_v57 = vld [vmem:[#allocation3 + $0x130] sm:$0xff]  ;;  %v113_v19 = vrot.slane %v1963_v56, %v112_v12 }
 0x122   :  { %v1980_v27 = vsel %vm329_vm1, %v1725_v22, 0.0  ;;  %v2003_v49 = vadd.f32 %v221_v25, %v109_v4  ;;  %v1591_v59 = vpack.c.bf16 %v98_v57, %v94_v55  ;;  %v506_v4 = vld [vmem:[#allocation5 + $0xa8] sm:$0xff]  ;;  %v615_v57 = vld [vmem:[#allocation5 + $0xc0] sm:$0xff]  ;;  %vm344_vm1 = vcmp.gt.s32.totalorder %v2005_v51, 3 }
 0x123   :  { %1730 = vtanh.f32 %v220_v24  ;;  %388 = vrot.lane.b32.xlu1 %v220_v24, %s1844_s20  ;;  %627 = vrot.lane.b32.xlu0 %v1976_v23, %s1844_s20 }
 0x124   :  { %1415 = vmatprep.mubr.msk.f32.mxu0 %vm394_vm2, %v1980_v27  ;;  %1592 = vmatpush1.bf16.msra.mxu1 %v1591_v59 }
 0x125   :  { %v1727_v34 = vpop.eup %1726  ;;  %1610 = vmatprep.subr.bf16.mxu1 %v1609_v63 }
 0x126   :  { %v1994_v42 = vsel %vm330_vm3, %v1727_v34, 0.0  ;;  %v117_v34 = vrot.slane %v1963_v56, %v116_v29  ;;  %vm345_vm3 = vcmp.gt.s32.totalorder %v1968_v2, 4 }
 0x127   :  { %629 = vrot.lane.b32.xlu1 %v1990_v35, %s1844_s20  ;;  %631 = vrot.lane.b32.xlu0 %v1992_v36, %s1844_s20 }
 0x128   :  { %1416 = vmatmul.mubr.msk.f32.vlgmr.msra.gmra.mrb[8].mxu0 %vm394_vm2, %v1994_v42  ;;  %1281 = vmatmul.mubr.msk.f32.vlgmr.msra.gmra.mrb[0].mxu1 %vm122_vm0, %v1929_v37  ;;  %v503_v37 = vld [vmem:[#allocation5 + $0x90] sm:$0xff] }
 0x129   :  { %v1729_v48 = vpop.eup %1728  ;;  %294 = vmatprep.mubr.f32.mxu1 %v1842_v1  ;;  %1612 = vmatpush3.bf16.msra.mxu1 %v1609_v63  ;;  %v1613_v3 = vpack.c.bf16 %v504_v0, %v503_v37  ;;  %v619_v63 = vld [vmem:[#allocation5 + $0xe0] sm:$0xff]  ;;  %v620_v37 = vld [vmem:[#allocation5 + $0xe8] sm:$0xff] }
 0x12a   :  { %v2007_v52 = vsel %vm331_vm4, %v1729_v48, 0.0  ;;  %v1633_v0 = vpack.c.bf16 %v620_v37, %v619_v63  ;;  %vm346_vm4 = vcmp.gt.s32.totalorder %v1974_v20, 4 }
 0x12b   :  { %633 = vrot.lane.b32.xlu1 %v2003_v49, %s1844_s20  ;;  %1418 = vmatprep.mubr.msk.f32.mxu0 %vm394_vm2, %v2007_v52 }
 0x12c   :  { %1282 = vmatmul.mubr.msk.f32.gmra.mrb[2].mxu1 %vm122_vm0, %v1937_v38  ;;  %1614 = vmatprep.subr.bf16.mxu1 %v1613_v3  ;;  %v505_v38 = vld [vmem:[#allocation5 + $0xa0] sm:$0xff] }
 0x12d   :  { %v1731_v58 = vpop.eup %1730  ;;  %300 = vmatprep.mubr.f32.mxu1 %v1842_v1  ;;  %1616 = vmatpush3.bf16.msra.mxu1 %v1613_v3  ;;  %v1617_v5 = vpack.c.bf16 %v506_v4, %v505_v38  ;;  %v621_v3 = vld [vmem:[#allocation5 + $0xf0] sm:$0xff]  ;;  %v622_v38 = vld [vmem:[#allocation5 + $0xf8] sm:$0xff] }
 0x12e   :  { %v2014_v60 = vsel %vm332_vm5, %v1731_v58, 0.0  ;;  %v616_v58 = vld [vmem:[#allocation5 + $0xc8] sm:$0xff]  ;;  %v1637_v4 = vpack.c.bf16 %v622_v38, %v621_v3  ;;  %vm347_vm5 = vcmp.gt.s32.totalorder %v1988_v33, 4 }
 0x12f   :  { %1419 = vmatmul.mubr.msk.f32.gmra.mrb[10].mxu0 %vm394_vm2, %v2014_v60  ;;  %1618 = vmatprep.subr.bf16.mxu1 %v1617_v5  ;;  %v1625_v59 = vpack.c.bf16 %v616_v58, %v615_v57  ;;  %v860_v3 = vld [vmem:[#allocation5 + $0x148] sm:$0xff] }
 0x130   :  { %1283 = vmatmul.mubr.msk.f32.gmra.mrb[4].mxu1 %vm122_vm0, %v1945_v39  ;;  %v507_v39 = vld [vmem:[#allocation5 + $0xb0] sm:$0xff] }
 0x131   :  { %306 = vmatprep.mubr.f32.mxu1 %v1842_v1  ;;  %1620 = vmatpush3.bf16.msra.mxu1 %v1617_v5  ;;  %v508_v1 = vld [vmem:[#allocation5 + $0xb8] sm:$0xff] }
 0x132   :  { %v1621_v6 = vpack.c.bf16 %v508_v1, %v507_v39  ;;  %1626 = vmatprep.subr.bf16.mxu0 %v1625_v59 }
 0x133   :  { %1628 = vmatpush3.bf16.msra.mxu0 %v1625_v59 }
 0x134   :  { %1284 = vmatmul.mubr.msk.f32.gmra.mrb[6].mxu1 %vm122_vm0, %v1953_v40  ;;  %1622 = vmatprep.subr.bf16.mxu1 %v1621_v6  ;;  %vm343_vm0 = vcmp.gt.s32.totalorder %v1988_v33, 3 }
 0x135   :  { %1624 = vmatpush3.bf16.msra.mxu1 %v1621_v6 }
 0x189   :  { %v383_v8 = vpop.permute.xlu0 %382 }
 0x18d   :  { %v385_v40 = vpop.permute.xlu1 %384 }
 0x191   :  { %v387_v15 = vpop.permute.xlu0 %386 }
 0x195   :  { %v389_v13 = vpop.permute.xlu1 %388 }
 0x1fb   :  { %v1417_v7 = vpop.f32.mrb[8].mxu0  ;;  %v290_v21 = vpop.f32.mrb[0].mxu1 }
 0x1fc   :  { %v479_v9 = vadd.f32 %v1417_v7, %v385_v40  ;;  %v473_v10 = vpop.f32.mrb[9].mxu0  ;;  %v2031_v24 = vadd.f32 %v290_v21, %v113_v19  ;;  %v292_v25 = vpop.f32.mrb[1].mxu1  ;;  %v749_v21 = vld [vmem:[#allocation5 + $0x120] sm:$0xff] }
 0x1fd   :  { %v474_v11 = vadd.f32 %v473_v10, %v383_v8  ;;  %v2060_v56 = vadd.f32 %v292_v25, %v117_v34 }
 0x1fe   :  { %1732 = vtanh.f32 %v479_v9  ;;  %871 = vrot.lane.b32.xlu0 %v2031_v24, %s1844_s20 }
 0x1ff   :  { %1734 = vtanh.f32 %v474_v11  ;;  %v296_v31 = vpop.f32.mrb[2].mxu1 }
 0x200   :  { %v2048_v32 = vadd.f32 %v296_v31, %v113_v19 }
 0x202   :  { %v1420_v14 = vpop.f32.mrb[10].mxu0  ;;  %873 = vrot.lane.b32.xlu1 %v2048_v32, %s1844_s20 }
 0x203   :  { %v489_v16 = vadd.f32 %v1420_v14, %v389_v13  ;;  %v483_v17 = vpop.f32.mrb[11].mxu0  ;;  %v745_v14 = vld [vmem:[#allocation5 + $0x100] sm:$0xff] }
 0x204   :  { %v484_v18 = vadd.f32 %v483_v17, %v387_v15  ;;  %v746_v15 = vld [vmem:[#allocation5 + $0x108] sm:$0xff]  ;;  %v747_v17 = vld [vmem:[#allocation5 + $0x110] sm:$0xff] }
 0x205   :  { %1736 = vtanh.f32 %v489_v16  ;;  %v1641_v16 = vpack.c.bf16 %v746_v15, %v745_v14 }
 0x206   :  { %1738 = vtanh.f32 %v484_v18  ;;  %v748_v18 = vld [vmem:[#allocation5 + $0x118] sm:$0xff] }
 0x207   :  { %1642 = vmatprep.subr.bf16.mxu1 %v1641_v16 }
 0x208   :  { %v1733_v22 = vpop.eup %1732 }
 0x209   :  { %v1735_v26 = vpop.eup %1734  ;;  %v2044_v30 = vsel %vm334_vm7, %v1733_v22, %v1994_v42  ;;  %v750_v22 = vld [vmem:[#allocation5 + $0x128] sm:$0xff]  ;;  %vm349_vm7 = vcmp.gt.s32.totalorder %v1968_v2, 5 }
 0x20a   :  { %v2035_v28 = vsel %vm333_vm6, %v1735_v26, %v1980_v27  ;;  %v298_v27 = vpop.f32.mrb[3].mxu1  ;;  %v1649_v25 = vpack.c.bf16 %v750_v22, %v749_v21  ;;  %v751_v26 = vld [vmem:[#allocation5 + $0x130] sm:$0xff]  ;;  %vm348_vm6 = vcmp.gt.s32.totalorder %v2005_v51, 4 }
 0x20b   :  { %1437 = vmatprep.mubr.msk.f32.mxu1 %vm394_vm2, %v2035_v28  ;;  %v302_v41 = vpop.f32.mrb[4].mxu1  ;;  %v2067_v53 = vadd.f32 %v298_v27, %v117_v34  ;;  %v628_v27 = vpop.permute.xlu0 %627  ;;  %v991_v22 = vld [vmem:[#allocation5 + $0x190] sm:$0xff] }
 0x20c   :  { %1438 = vmatmul.mubr.msk.f32.vlgmr.msra.gmra.mrb[8].mxu1 %vm394_vm2, %v2044_v30  ;;  %v2054_v44 = vadd.f32 %v302_v41, %v113_v19  ;;  %v304_v42 = vpop.f32.mrb[5].mxu1 }
 0x20d   :  { %v308_v47 = vpop.f32.mrb[6].mxu1  ;;  %1644 = vmatpush3.bf16.msra.mxu1 %v1641_v16 }
 0x20e   :  { %875 = vrot.lane.b32.xlu0 %v2054_v44, %s1844_s20  ;;  %v2065_v48 = vadd.f32 %v308_v47, %v113_v19  ;;  %v310_v50 = vpop.f32.mrb[7].mxu1  ;;  %v1645_v19 = vpack.c.bf16 %v748_v18, %v747_v17  ;;  %v989_v18 = vld [vmem:[#allocation5 + $0x180] sm:$0xff] }
 0x20f   :  { %v1737_v54 = vpop.eup %1736  ;;  %v2077_v55 = vadd.f32 %v310_v50, %v117_v34 }
 0x210   :  { %v1739_v43 = vpop.eup %1738  ;;  %v499_v46 = vsel %vm336_vm9, %v1737_v54, %v2014_v60  ;;  %877 = vrot.lane.b32.xlu1 %v2065_v48, %s1844_s20  ;;  %v617_v60 = vld [vmem:[#allocation5 + $0xd0] sm:$0xff]  ;;  %1646 = vmatprep.subr.bf16.mxu1 %v1645_v19  ;;  %vm351_vm9 = vcmp.gt.s32.totalorder %v1988_v33, 5 }
 0x211   :  { %v498_v45 = vsel %vm335_vm8, %v1739_v43, %v2007_v52  ;;  %v2069_v52 = vadd.f32 %v304_v42, %v117_v34  ;;  %v1629_v62 = vpack.c.bf16 %v618_v61, %v617_v60  ;;  %1648 = vmatpush3.bf16.msra.mxu1 %v1645_v19  ;;  %v990_v19 = vld [vmem:[#allocation5 + $0x188] sm:$0xff]  ;;  %vm350_vm8 = vcmp.gt.s32.totalorder %v1974_v20, 5 }
 0x212   :  { %1440 = vmatprep.mubr.msk.f32.mxu1 %vm394_vm2, %v498_v45  ;;  %1115 = vrot.lane.b32.xlu0 %v2060_v56, %s1844_s20  ;;  %v1673_v21 = vpack.c.bf16 %v990_v19, %v989_v18 }
 0x213   :  { %1441 = vmatmul.mubr.msk.f32.gmra.mrb[10].mxu1 %vm394_vm2, %v499_v46  ;;  %1630 = vmatprep.subr.bf16.mxu0 %v1629_v62 }
 0x214   :  { %1117 = vrot.lane.b32.xlu1 %v2067_v53, %s1844_s20  ;;  %1632 = vmatpush3.bf16.msra.mxu0 %v1629_v62 }
 0x215   :  { %1634 = vmatprep.subr.bf16.mxu0 %v1633_v0  ;;  %1650 = vmatprep.subr.bf16.mxu1 %v1649_v25 }
 0x216   :  { %1119 = vrot.lane.b32.xlu0 %v2069_v52, %s1844_s20  ;;  %1652 = vmatpush3.bf16.msra.mxu1 %v1649_v25  ;;  %v992_v25 = vld [vmem:[#allocation5 + $0x198] sm:$0xff] }
 0x218   :  { %1121 = vrot.lane.b32.xlu1 %v2077_v55, %s1844_s20  ;;  %1636 = vmatpush3.bf16.msra.mxu0 %v1633_v0  ;;  %v859_v0 = vld [vmem:[#allocation5 + $0x140] sm:$0xff] }
 0x219   :  { %1638 = vmatprep.subr.bf16.mxu0 %v1637_v4  ;;  %v1657_v38 = vpack.c.bf16 %v860_v3, %v859_v0 }
 0x21c   :  { %1640 = vmatpush3.bf16.msra.mxu0 %v1637_v4  ;;  %v861_v4 = vld [vmem:[#allocation5 + $0x150] sm:$0xff] }
 0x21d   :  { %1658 = vmatprep.subr.bf16.mxu0 %v1657_v38 }
 0x2df   :  { %v1439_v5 = vpop.f32.mrb[8].mxu1 }
 0x2e0   :  { %v593_v39 = vadd.f32 %v1439_v5, %v1990_v35  ;;  %v587_v1 = vpop.f32.mrb[9].mxu1  ;;  %v862_v5 = vld [vmem:[#allocation5 + $0x158] sm:$0xff] }
 0x2e1   :  { %v588_v6 = vadd.f32 %v587_v1, %v1976_v23  ;;  %v863_v1 = vld [vmem:[#allocation5 + $0x160] sm:$0xff] }
 0x2e2   :  { %1740 = vtanh.f32 %v593_v39  ;;  %v1661_v39 = vpack.c.bf16 %v862_v5, %v861_v4  ;;  %v1103_v5 = vld [vmem:[#allocation5 + $0x1c0] sm:$0xff] }
 0x2e3   :  { %1742 = vtanh.f32 %v588_v6  ;;  %v864_v6 = vld [vmem:[#allocation5 + $0x168] sm:$0xff] }
 0x2e6   :  { %v1442_v40 = vpop.f32.mrb[10].mxu1 }
 0x2e7   :  { %v603_v7 = vadd.f32 %v1442_v40, %v2003_v49  ;;  %v597_v8 = vpop.f32.mrb[11].mxu1  ;;  %v1665_v40 = vpack.c.bf16 %v864_v6, %v863_v1  ;;  %v1105_v6 = vld [vmem:[#allocation5 + $0x1d0] sm:$0xff] }
 0x2e8   :  { %v598_v9 = vadd.f32 %v597_v8, %v1992_v36  ;;  %v866_v8 = vld [vmem:[#allocation5 + $0x178] sm:$0xff] }
 0x2e9   :  { %1744 = vtanh.f32 %v603_v7  ;;  %v865_v7 = vld [vmem:[#allocation5 + $0x170] sm:$0xff] }
 0x2ea   :  { %1746 = vtanh.f32 %v598_v9  ;;  %v1669_v9 = vpack.c.bf16 %v866_v8, %v865_v7  ;;  %v1107_v8 = vld [vmem:[#allocation5 + $0x1e0] sm:$0xff] }
 0x2ec   :  { %v1741_v10 = vpop.eup %1740 }
 0x2ed   :  { %v1743_v11 = vpop.eup %1742  ;;  %v611_v23 = vsel %vm338_vm11, %v1741_v10, %v2044_v30  ;;  %v630_v30 = vpop.permute.xlu1 %629  ;;  %vm353_vm11 = vcmp.gt.s32.totalorder %v1968_v2, 6 }
 0x2ee   :  { %v610_v12 = vsel %vm337_vm10, %v1743_v11, %v2035_v28  ;;  %v752_v28 = vld [vmem:[#allocation5 + $0x138] sm:$0xff]  ;;  %vm352_vm10 = vcmp.gt.s32.totalorder %v2005_v51, 5 }
 0x2ef   :  { %1459 = vmatprep.mubr.msk.f32.mxu0 %vm394_vm2, %v610_v12  ;;  %v1653_v29 = vpack.c.bf16 %v752_v28, %v751_v26  ;;  %v1677_v26 = vpack.c.bf16 %v992_v25, %v991_v22  ;;  %v993_v28 = vld [vmem:[#allocation5 + $0x1a0] sm:$0xff] }
 0x2f0   :  { %1460 = vmatmul.mubr.msk.f32.vlgmr.msra.gmra.mrb[12].mxu0 %vm394_vm2, %v611_v23 }
 0x2f1   :  { %1654 = vmatprep.subr.bf16.mxu1 %v1653_v29  ;;  %v634_v43 = vpop.permute.xlu1 %633  ;;  %1660 = vmatpush3.bf16.msra.mxu0 %v1657_v38 }
 0x2f2   :  { %1656 = vmatpush3.bf16.msra.mxu1 %v1653_v29  ;;  %1662 = vmatprep.subr.bf16.mxu0 %v1661_v39  ;;  %v994_v29 = vld [vmem:[#allocation5 + $0x1a8] sm:$0xff] }
 0x2f3   :  { %v1745_v35 = vpop.eup %1744  ;;  %1674 = vmatprep.subr.bf16.mxu1 %v1673_v21 }
 0x2f4   :  { %v1747_v49 = vpop.eup %1746  ;;  %v613_v13 = vsel %vm340_vm13, %v1745_v35, %v499_v46  ;;  %vm355_vm13 = vcmp.gt.s32.totalorder %v1988_v33, 6 }
 0x2f5   :  { %v612_v36 = vsel %vm339_vm12, %v1747_v49, %v498_v45  ;;  %v632_v45 = vpop.permute.xlu0 %631  ;;  %1664 = vmatpush3.bf16.msra.mxu0 %v1661_v39  ;;  %v1104_v39 = vld [vmem:[#allocation5 + $0x1c8] sm:$0xff]  ;;  %vm354_vm12 = vcmp.gt.s32.totalorder %v1974_v20, 6 }
 0x2f6   :  { %1462 = vmatprep.mubr.msk.f32.mxu0 %vm394_vm2, %v612_v36  ;;  %1666 = vmatprep.subr.bf16.mxu0 %v1665_v40  ;;  %v1689_v1 = vpack.c.bf16 %v1104_v39, %v1103_v5 }
 0x2f7   :  { %1463 = vmatmul.mubr.msk.f32.gmra.mrb[14].mxu0 %vm394_vm2, %v613_v13 }
 0x2f9   :  { %1668 = vmatpush3.bf16.msra.mxu0 %v1665_v40  ;;  %v1106_v40 = vld [vmem:[#allocation5 + $0x1d8] sm:$0xff] }
 0x2fa   :  { %1670 = vmatprep.subr.bf16.mxu0 %v1669_v9  ;;  %v1693_v7 = vpack.c.bf16 %v1106_v40, %v1105_v6 }
 0x2fd   :  { %1672 = vmatpush3.bf16.msra.mxu0 %v1669_v9  ;;  %v1108_v9 = vld [vmem:[#allocation5 + $0x1e8] sm:$0xff] }
 0x2fe   :  { %1690 = vmatprep.subr.bf16.mxu0 %v1689_v1 }
 0x3c3   :  { %v1461_v31 = vpop.f32.mrb[12].mxu0 }
 0x3c4   :  { %v723_v34 = vadd.f32 %v1461_v31, %v630_v30  ;;  %v717_v54 = vpop.f32.mrb[13].mxu0  ;;  %v1681_v30 = vpack.c.bf16 %v994_v29, %v993_v28  ;;  %v995_v31 = vld [vmem:[#allocation5 + $0x1b0] sm:$0xff] }
 0x3c5   :  { %v718_v41 = vadd.f32 %v717_v54, %v628_v27  ;;  %v996_v27 = vld [vmem:[#allocation5 + $0x1b8] sm:$0xff]  ;;  %v874_v54 = vpop.permute.xlu1 %873 }
 0x3c6   :  { %1748 = vtanh.f32 %v723_v34  ;;  %v1685_v34 = vpack.c.bf16 %v996_v27, %v995_v31 }
 0x3c7   :  { %1750 = vtanh.f32 %v718_v41 }
 0x3ca   :  { %v1464_v42 = vpop.f32.mrb[14].mxu0 }
 0x3cb   :  { %v733_v46 = vadd.f32 %v1464_v42, %v634_v43  ;;  %v727_v47 = vpop.f32.mrb[15].mxu0  ;;  %v872_v43 = vpop.permute.xlu0 %871 }
 0x3cc   :  { %v728_v50 = vadd.f32 %v727_v47, %v632_v45  ;;  %v878_v47 = vpop.permute.xlu1 %877 }
 0x3cd   :  { %1752 = vtanh.f32 %v733_v46 }
 0x3ce   :  { %1754 = vtanh.f32 %v728_v50 }
 0x3d0   :  { %v1749_v57 = vpop.eup %1748  ;;  %v1118_v18 = vpop.permute.xlu1 %1117 }
 0x3d1   :  { %v1751_v58 = vpop.eup %1750  ;;  %v741_v60 = vsel %vm342_vm15, %v1749_v57, %v611_v23  ;;  %v876_v57 = vpop.permute.xlu0 %875  ;;  %vm358_vm15 = vcmp.gt.s32.totalorder %v1974_v20, 7 }
 0x3d2   :  { %v740_v59 = vsel %vm341_vm14, %v1751_v58, %v610_v12  ;;  %vm356_vm14 = vcmp.gt.s32.totalorder %v2005_v51, 6 }
 0x3d3   :  { %1481 = vmatprep.mubr.msk.f32.mxu1 %vm394_vm2, %v740_v59 }
 0x3d4   :  { %1482 = vmatmul.mubr.msk.f32.vlgmr.msra.gmra.mrb[12].mxu1 %vm394_vm2, %v741_v60  ;;  %v1122_v28 = vpop.permute.xlu1 %1121 }
 0x3d5   :  { %1676 = vmatpush3.bf16.msra.mxu1 %v1673_v21  ;;  %v1116_v21 = vpop.permute.xlu0 %1115 }
 0x3d6   :  { %1678 = vmatprep.subr.bf16.mxu1 %v1677_v26 }
 0x3d7   :  { %v1753_v61 = vpop.eup %1752 }
 0x3d8   :  { %v1755_v62 = vpop.eup %1754  ;;  %v743_v37 = vsel %vm344_vm1, %v1753_v61, %v613_v13  ;;  %vm359_vm1 = vcmp.gt.s32.totalorder %v1988_v33, 7 }
 0x3d9   :  { %v742_v63 = vsel %vm343_vm0, %v1755_v62, %v612_v36  ;;  %1680 = vmatpush3.bf16.msra.mxu1 %v1677_v26  ;;  %vm357_vm0 = vcmp.gt.s32.totalorder %v1968_v2, 7 }
 0x3da   :  { %1484 = vmatprep.mubr.msk.f32.mxu1 %vm394_vm2, %v742_v63  ;;  %1682 = vmatprep.subr.bf16.mxu1 %v1681_v30 }
 0x3db   :  { %1485 = vmatmul.mubr.msk.f32.gmra.mrb[14].mxu1 %vm394_vm2, %v743_v37 }
 0x3dd   :  { %1684 = vmatpush3.bf16.msra.mxu1 %v1681_v30  ;;  %v1120_v30 = vpop.permute.xlu0 %1119 }
 0x3de   :  { %1686 = vmatprep.subr.bf16.mxu1 %v1685_v34 }
 0x3e1   :  { %1688 = vmatpush3.bf16.msra.mxu1 %v1685_v34 }
 0x3e2   :  { %1705 = vmatprep.subr.bf16.mxu1 %v1689_v1 }
 0x4a7   :  { %v1483_v10 = vpop.f32.mrb[12].mxu1 }
 0x4a8   :  { %v837_v11 = vadd.f32 %v1483_v10, %v2048_v32  ;;  %v831_v12 = vpop.f32.mrb[13].mxu1  ;;  %v1697_v10 = vpack.c.bf16 %v1108_v9, %v1107_v8 }
 0x4a9   :  { %v832_v23 = vadd.f32 %v831_v12, %v2031_v24  ;;  %v1110_v12 = vld [vmem:[#allocation5 + $0x1f8] sm:$0xff] }
 0x4aa   :  { %1756 = vtanh.f32 %v837_v11  ;;  %v1109_v11 = vld [vmem:[#allocation5 + $0x1f0] sm:$0xff] }
 0x4ab   :  { %1758 = vtanh.f32 %v832_v23  ;;  %v1701_v23 = vpack.c.bf16 %v1110_v12, %v1109_v11 }
 0x4ae   :  { %v1486_v35 = vpop.f32.mrb[14].mxu1 }
 0x4af   :  { %v847_v49 = vadd.f32 %v1486_v35, %v2065_v48  ;;  %v841_v36 = vpop.f32.mrb[15].mxu1 }
 0x4b0   :  { %v842_v13 = vadd.f32 %v841_v36, %v2054_v44 }
 0x4b1   :  { %1760 = vtanh.f32 %v847_v49 }
 0x4b2   :  { %1762 = vtanh.f32 %v842_v13 }
 0x4b4   :  { %v1757_v14 = vpop.eup %1756 }
 0x4b5   :  { %v1759_v15 = vpop.eup %1758  ;;  %v855_v24 = vsel %vm346_vm4, %v1757_v14, %v741_v60  ;;  %vm1266_vm4 = vcmask 7168  }
 0x4b6   :  { %v854_v16 = vsel %vm345_vm3, %v1759_v15, %v740_v59  ;;  %vm360_vm3 = vcmp.gt.s32.totalorder %v2005_v51, 7 }
 0x4b7   :  { %1503 = vmatprep.mubr.msk.f32.mxu0 %vm394_vm2, %v854_v16 }
 0x4b8   :  { %1504 = vmatmul.mubr.msk.f32.vlgmr.msra.gmra.mrb[16].mxu0 %vm394_vm2, %v855_v24 }
 0x4b9   :  { %1692 = vmatpush3.bf16.msra.mxu0 %v1689_v1 }
 0x4ba   :  { %1694 = vmatprep.subr.bf16.mxu0 %v1693_v7 }
 0x4bb   :  { %v1761_v32 = vpop.eup %1760 }
 0x4bc   :  { %v1763_v17 = vpop.eup %1762  ;;  %v857_v44 = vsel %vm348_vm6, %v1761_v32, %v743_v37 }
 0x4bd   :  { %v856_v48 = vsel %vm347_vm5, %v1763_v17, %v742_v63  ;;  %1696 = vmatpush3.bf16.msra.mxu0 %v1693_v7 }
 0x4be   :  { %1506 = vmatprep.mubr.msk.f32.mxu0 %vm394_vm2, %v856_v48  ;;  %1698 = vmatprep.subr.bf16.mxu0 %v1697_v10 }
 0x4bf   :  { %1507 = vmatmul.mubr.msk.f32.gmra.mrb[18].mxu0 %vm394_vm2, %v857_v44 }
 0x4c1   :  { %1700 = vmatpush3.bf16.msra.mxu0 %v1697_v10 }
 0x4c2   :  { %1702 = vmatprep.subr.bf16.mxu0 %v1701_v23 }
 0x4c5   :  { %1704 = vmatpush3.bf16.msra.mxu0 %v1701_v23 }
 0x58b   :  { %v1505_v41 = vpop.f32.mrb[16].mxu0 }
 0x58c   :  { %v967_v42 = vadd.f32 %v1505_v41, %v874_v54  ;;  %v961_v45 = vpop.f32.mrb[17].mxu0  ;;  %v1313_v54 = vld [vmem:[%s2165_s5] ss:$0 sm:$0xff] }
 0x58d   :  { %v962_v46 = vadd.f32 %v961_v45, %v872_v43 }
 0x58e   :  { %1764 = vtanh.f32 %v967_v42 }
 0x58f   :  { %1766 = vtanh.f32 %v962_v46 }
 0x592   :  { %v1508_v50 = vpop.f32.mrb[18].mxu0 }
 0x593   :  { %v977_v58 = vadd.f32 %v1508_v50, %v878_v47  ;;  %v971_v59 = vpop.f32.mrb[19].mxu0 }
 0x594   :  { %v972_v60 = vadd.f32 %v971_v59, %v876_v57 }
 0x595   :  { %1768 = vtanh.f32 %v977_v58 }
 0x596   :  { %1770 = vtanh.f32 %v972_v60 }
 0x598   :  { %v1765_v61 = vpop.eup %1764 }
 0x599   :  { %v1767_v62 = vpop.eup %1766  ;;  %v985_v37 = vsel %vm350_vm8, %v1765_v61, %v855_v24 }
 0x59a   :  { %v984_v63 = vsel %vm349_vm7, %v1767_v62, %v854_v16 }
 0x59b   :  { %1525 = vmatprep.mubr.msk.f32.mxu1 %vm394_vm2, %v984_v63 }
 0x59c   :  { %1526 = vmatmul.mubr.msk.f32.vlgmr.msra.gmra.mrb[16].mxu1 %vm394_vm2, %v985_v37 }
 0x59d   :  { %1709 = vmatpush3.bf16.msra.mxu1 %v1689_v1 }
 0x59e   :  { %1706 = vmatprep.subr.bf16.mxu1 %v1693_v7 }
 0x59f   :  { %v1769_v0 = vpop.eup %1768 }
 0x5a0   :  { %v1771_v3 = vpop.eup %1770  ;;  %v987_v4 = vsel %vm352_vm10, %v1769_v0, %v857_v44 }
 0x5a1   :  { %v986_v38 = vsel %vm351_vm9, %v1771_v3, %v856_v48  ;;  %1710 = vmatpush3.bf16.msra.mxu1 %v1693_v7 }
 0x5a2   :  { %1528 = vmatprep.mubr.msk.f32.mxu1 %vm394_vm2, %v986_v38  ;;  %1707 = vmatprep.subr.bf16.mxu1 %v1697_v10 }
 0x5a3   :  { %1529 = vmatmul.mubr.msk.f32.gmra.mrb[18].mxu1 %vm394_vm2, %v987_v4 }
 0x5a5   :  { %1711 = vmatpush3.bf16.msra.mxu1 %v1697_v10 }
 0x5a6   :  { %1708 = vmatprep.subr.bf16.mxu1 %v1701_v23 }
 0x5a9   :  { %1712 = vmatpush3.bf16.msra.mxu1 %v1701_v23 }
 0x66f   :  { %v1527_v35 = vpop.f32.mrb[16].mxu1 }
 0x670   :  { %v1081_v49 = vadd.f32 %v1527_v35, %v2067_v53  ;;  %v1075_v36 = vpop.f32.mrb[17].mxu1 }
 0x671   :  { %v1076_v13 = vadd.f32 %v1075_v36, %v2060_v56 }
 0x672   :  { %1772 = vtanh.f32 %v1081_v49 }
 0x673   :  { %1774 = vtanh.f32 %v1076_v13 }
 0x676   :  { %v1530_v14 = vpop.f32.mrb[18].mxu1 }
 0x677   :  { %v1091_v15 = vadd.f32 %v1530_v14, %v2077_v55  ;;  %v1085_v16 = vpop.f32.mrb[19].mxu1 }
 0x678   :  { %v1086_v24 = vadd.f32 %v1085_v16, %v2069_v52 }
 0x679   :  { %1776 = vtanh.f32 %v1091_v15 }
 0x67a   :  { %1778 = vtanh.f32 %v1086_v24 }
 0x67c   :  { %v1773_v32 = vpop.eup %1772 }
 0x67d   :  { %v1775_v17 = vpop.eup %1774  ;;  %v1099_v56 = vsel %vm354_vm12, %v1773_v32, %v985_v37  ;;  %v1314_v37 = vld [vmem:[#allocation2] ss:$0 sm:$0xff] }
 0x67e   :  { %v1098_v48 = vsel %vm353_vm11, %v1775_v17, %v984_v63 }
 0x67f   :  { %1547 = vmatprep.mubr.msk.f32.mxu0 %vm394_vm2, %v1098_v48 }
 0x680   :  { %1548 = vmatmul.mubr.msk.f32.vlgmr.msra.gmra.mrb[20].mxu0 %vm394_vm2, %v1099_v56 }
 0x683   :  { %v1777_v53 = vpop.eup %1776 }
 0x684   :  { %v1779_v44 = vpop.eup %1778  ;;  %v1101_v52 = vsel %vm356_vm14, %v1777_v53, %v987_v4 }
 0x685   :  { %v1100_v55 = vsel %vm355_vm13, %v1779_v44, %v986_v38 }
 0x686   :  { %1550 = vmatprep.mubr.msk.f32.mxu1 %vm394_vm2, %v1100_v55 }
 0x687   :  { %1551 = vmatmul.mubr.msk.f32.vlgmr.msra.gmra.mrb[20].mxu1 %vm394_vm2, %v1101_v52 }
 0x753   :  { %v1549_v19 = vpop.f32.mrb[20].mxu0 }
 0x754   :  { %v1211_v22 = vadd.f32 %v1549_v19, %v1118_v18  ;;  %v1205_v25 = vpop.f32.mrb[21].mxu0 }
 0x755   :  { %v1206_v26 = vadd.f32 %v1205_v25, %v1116_v21 }
 0x756   :  { %1780 = vtanh.f32 %v1211_v22 }
 0x757   :  { %1782 = vtanh.f32 %v1206_v26 }
 0x75a   :  { %v1552_v29 = vpop.f32.mrb[20].mxu1 }
 0x75b   :  { %v1221_v31 = vadd.f32 %v1552_v29, %v1122_v28  ;;  %v1215_v27 = vpop.f32.mrb[21].mxu1 }
 0x75c   :  { %v1216_v34 = vadd.f32 %v1215_v27, %v1120_v30 }
 0x75d   :  { %1784 = vtanh.f32 %v1221_v31 }
 0x75e   :  { %1786 = vtanh.f32 %v1216_v34 }
 0x760   :  { %v1781_v41 = vpop.eup %1780 }
 0x761   :  { %v1783_v43 = vpop.eup %1782  ;;  %v1229_v42 = vsel %vm358_vm15, %v1781_v41, %v1099_v56 }
 0x762   :  { %v1240_v45 = vmul.f32 %v1313_v54, %v1229_v42  ;;  %v1228_v46 = vsel %vm357_vm0, %v1783_v43, %v1098_v48 }
 0x763   :  { %v1239_v47 = vmul.f32 %v1313_v54, %v1228_v46 }
 0x764   :  { %v1246_v50 = vsel %vm394_vm2, %v1240_v45, 0.0 }
 0x765   :  { %1247 = vadd.xlane.f32.xlu1 %v1246_v50  ;;  %v1243_v57 = vsel %vm394_vm2, %v1239_v47, 0.0 }
 0x766   :  { %1244 = vadd.xlane.f32.xlu0 %v1243_v57 }
 0x767   :  { %v1785_v58 = vpop.eup %1784 }
 0x768   :  { %v1787_v59 = vpop.eup %1786  ;;  %v1231_v60 = vsel %vm360_vm3, %v1785_v58, %v1101_v52 }
 0x769   :  { %v1230_v20 = vsel %vm359_vm1, %v1787_v59, %v1100_v55  ;;  %v1242_v62 = vmul.f32 %v1313_v54, %v1231_v60 }
 0x76a   :  { %v1241_v61 = vmul.f32 %v1313_v54, %v1230_v20 }
 0x76b   :  { %v1252_v63 = vsel %vm394_vm2, %v1242_v62, 0.0 }
 0x76c   :  { %v1249_v2 = vsel %vm394_vm2, %v1241_v61, 0.0 }
 0x76d   :  { %1250 = vadd.xlane.f32.xlu0 %v1249_v2 }
 0x771   :  { %1253 = vadd.xlane.f32.xlu0 %v1252_v63 }
 0x7f2   :  { %v1248_v0 = vpop.xlane.xlu1 %1247 }
 0x7f3   :  { %v1263_v3 = vadd.f32 %v1314_v37, %v1248_v0  ;;  %v1245_v38 = vpop.xlane.xlu0 %1244 }
 0x7f4   :  { %v1262_v4 = vadd.f32 %v1314_v37, %v1245_v38 }
 0x7f5   :  { %1268 = vst.msk [vmem:[%s2167_s7 + $0x8] sm:$0xff] %vm1266_vm4, %v1263_v3 }
 0x7f6   :  { %1267 = vst.msk [vmem:[%s2167_s7] sm:$0xff] %vm1266_vm4, %v1262_v4 }
 0x7fa   :  { %v1251_v33 = vpop.xlane.xlu0 %1250 }
 0x7fb   :  { %v1264_v51 = vadd.f32 %v1314_v37, %v1251_v33 }
 0x7fd   :  { %1269 = vst.msk [vmem:[%s2167_s7 + $0x10] sm:$0xff] %vm1266_vm4, %v1264_v51 }
 0x7fe   :  { %v1254_v5 = vpop.xlane.xlu0 %1253 }
 0x7ff   :  { %v1265_v39 = vadd.f32 %v1314_v37, %v1254_v5 }
 0x801   :  { %1270 = vst.msk [vmem:[%s2167_s7 + $0x18] sm:$0xff] %vm1266_vm4, %v1265_v39 }
 0x802   :  { %1275 = vsyncpa [#allocation4], 1 }
 0x803   :  { %1276 = vsyncpa [#allocation6], 1 }

</bundles_post_ra>
